<compile_context>
chip_gen: v6e
topology: v6e:2x2x1
jax: 0.10.0
libtpu: 0.0.40
codegen_flags: <defaults>
</compile_context>

<pallas_src>
import functools

import jax
import jax.numpy as jnp
from jax.experimental import pallas as pl
from jax.experimental.pallas import tpu as pltpu


def _round_up(x: int, m: int) -> int:
    return ((x + m - 1) // m) * m


def linear_kernel(x_ref, w_ref, b_ref, o_ref, acc_ref):
    # x_ref: (tm, tk), w_ref: (tk, tn) [pre-transposed, standard contraction],
    # b_ref: (1, tn), o_ref: (tm, tn), acc_ref: (tm, tn) f32 scratch.
    k = pl.program_id(2)

    @pl.when(k == 0)
    def _init():
        acc_ref[...] = jnp.zeros_like(acc_ref)

    acc_ref[...] += jnp.dot(
        x_ref[...], w_ref[...], preferred_element_type=jnp.float32
    )

    @pl.when(k == pl.num_programs(2) - 1)
    def _finalize():
        o_ref[...] = (acc_ref[...] + b_ref[...]).astype(o_ref.dtype)


@functools.partial(
    jax.jit, static_argnames=("tn", "tk", "max_tm", "mxu_dtype")
)
def simple_model_forward(x, weight, bias, *, tn=256, tk=512, max_tm=512,
                         mxu_dtype=None):
    """y = x @ weight.T + bias  (PyTorch nn.Linear semantics).

    x:      (B, n_inputs)           float32
    weight: (n_outputs, n_inputs)   PyTorch layout; re-laid-out once to (K, N)
    bias:   (n_outputs,)

    mxu_dtype: optionally jnp.bfloat16 for v6e/v7x MXU throughput (accumulation
    stays f32).  For repeated calls, cast the weight once upstream instead.
    """
    B, K = x.shape
    N, K2 = weight.shape
    assert K == K2 and bias.shape == (N,)
    out_dtype = x.dtype

    # One-time re-layout so the in-kernel contraction is the standard
    # (tm, tk) @ (tk, tn) — no per-tile XLU transpose risk on the MXU RHS.
    w_kn = weight.T  # (K, N)

    if mxu_dtype is not None:
        x = x.astype(mxu_dtype)
        w_kn = w_kn.astype(mxu_dtype)

    # ---- tile selection ----------------------------------------------------
    # Batch: cover it with a single tile whenever it fits so the weight is
    # streamed from HBM exactly once.  Full-dim block shapes are allowed by
    # the (8,128) rule, so no padding is needed in that case.
    if B <= max_tm:
        tm, Bp = B, B
    else:
        tm = max_tm                      # multiple of 8
        Bp = _round_up(B, tm)

    # N / K: full dim if it fits in one tile (no padding, no masked stores for
    # the common aligned sizes), otherwise 128-aligned tiles + zero padding.
    if N <= tn:
        tn, Np = N, N
    else:
        tn = min(tn, _round_up(N, 128))
        Np = _round_up(N, tn)
    if K <= tk:
        tk, Kp = K, K
    else:
        tk = min(tk, _round_up(K, 128))
        Kp = _round_up(K, tk)

    # ---- fallback padding for large unaligned shapes ------------------------
    if (Bp, Kp) != (B, K):
        x = jnp.pad(x, ((0, Bp - B), (0, Kp - K)))       # zero K-pad is exact
    if (Kp, Np) != (K, N):
        w_kn = jnp.pad(w_kn, ((0, Kp - K), (0, Np - N)))
    bias2 = bias
    if Np != N:
        bias2 = jnp.pad(bias2, (0, Np - N))
    bias2 = bias2.reshape(1, Np)

    grid = (Bp // tm, Np // tn, Kp // tk)

    # Advisory cost hint: account for the actual number of HBM passes
    # (weight re-read per batch tile, x re-read per N tile).
    cost = pl.CostEstimate(
        flops=2 * Bp * Np * Kp,
        transcendentals=0,
        bytes_accessed=(
            x.dtype.itemsize * Bp * Kp * (Np // tn)          # x passes
            + w_kn.dtype.itemsize * Kp * Np * (Bp // tm)     # weight passes
            + jnp.dtype(out_dtype).itemsize * Bp * Np        # output write
            + 4 * Np * (Bp // tm)                            # bias reads
        ),
    )

    out = pl.pallas_call(
        linear_kernel,
        out_shape=jax.ShapeDtypeStruct((Bp, Np), out_dtype),
        grid=grid,
        in_specs=[
            pl.BlockSpec((tm, tk), lambda i, j, k: (i, k)),   # x tile
            pl.BlockSpec((tk, tn), lambda i, j, k: (k, j)),   # weight (K, N) tile
            pl.BlockSpec((1, tn), lambda i, j, k: (0, j)),    # bias tile
        ],
        out_specs=pl.BlockSpec((tm, tn), lambda i, j, k: (i, j)),
        scratch_shapes=[pltpu.VMEM((tm, tn), jnp.float32)],
        compiler_params=pltpu.CompilerParams(
            dimension_semantics=("parallel", "parallel", "arbitrary"),
        ),
        cost_estimate=cost,
    )(x, w_kn, bias2)

    if (Bp, Np) != (B, N):
        out = out[:B, :N]
    return out


if __name__ == "__main__":
    key = jax.random.PRNGKey(0)
    kx, kw, kb = jax.random.split(key, 3)

    batch = 8
    n_inputs = 32
    n_outputs = 16

    # Deterministic parameter init (mimics nn.Linear's U(-1/sqrt(in), 1/sqrt(in))).
    bound = 1.0 / (n_inputs ** 0.5)
    weight = jax.random.uniform(
        kw, (n_outputs, n_inputs), jnp.float32, minval=-bound, maxval=bound
    )
    bias = jax.random.uniform(
        kb, (n_outputs,), jnp.float32, minval=-bound, maxval=bound
    )
    x = jax.random.normal(kx, (batch, n_inputs), jnp.float32)

    y = simple_model_forward(x, weight, bias)
    jax.block_until_ready(y)

    # Cross-check against plain JAX reference (nn.Linear semantics).
    y_ref = x @ weight.T + bias
    assert y.shape == (batch, n_outputs)
    assert jnp.allclose(y, y_ref, atol=1e-5, rtol=1e-5)

    print("KERNEL_OK")
</pallas_src>

<mosaic_0001>
module attributes {stable_mosaic.version = 11 : i64} {
  func.func @linear_kernel(%arg0: i32, %arg1: i32, %arg2: i32, %arg3: memref<8x32xf32, #tpu.memory_space<vmem>>, %arg4: memref<32x16xf32, #tpu.memory_space<vmem>>, %arg5: memref<1x16xf32, #tpu.memory_space<vmem>>, %arg6: memref<8x16xf32, #tpu.memory_space<vmem>>, %arg7: memref<8x16xf32, #tpu.memory_space<vmem>>) attributes {dimension_semantics = [#tpu.dimension_semantics<parallel>, #tpu.dimension_semantics<parallel>, #tpu.dimension_semantics<arbitrary>], iteration_bounds = array<i64: 1, 1, 1>, scalar_prefetch = 0 : i64, scratch_operands = 1 : i64, tpu.core_type = #tpu.core_type<tc>, window_params = [{transform_indices = @transform_0, window_bounds = array<i64: 8, 32>}, {transform_indices = @transform_1, window_bounds = array<i64: 32, 16>}, {transform_indices = @transform_2, window_bounds = array<i64: 1, 16>}, {transform_indices = @transform_3, window_bounds = array<i64: 8, 16>}]} {
    %c0_i32 = arith.constant 0 : i32
    %0 = arith.cmpi eq, %arg2, %c0_i32 : i32
    %1 = arith.extui %0 : i1 to i32
    %c0_i32_0 = arith.constant 0 : i32
    %2 = arith.cmpi ne, %1, %c0_i32_0 : i32
    scf.if %2 {
      %cst_10 = arith.constant 0.000000e+00 : f32
      %12 = vector.broadcast %cst_10 : f32 to vector<8x16xf32>
      %c0_11 = arith.constant 0 : index
      %c0_12 = arith.constant 0 : index
      %13 = vector.load %arg7[%c0_11, %c0_12] : memref<8x16xf32, #tpu.memory_space<vmem>>, vector<8x16xf32>
      tpu.vector_store %arg7[%c0_11, %c0_12], %12 {strides = array<i32>} : memref<8x16xf32, #tpu.memory_space<vmem>>, vector<8x16xf32>,
    } else {
    }
    %c0 = arith.constant 0 : index
    %c0_1 = arith.constant 0 : index
    %3 = vector.load %arg7[%c0, %c0_1] : memref<8x16xf32, #tpu.memory_space<vmem>>, vector<8x16xf32>
    %c0_2 = arith.constant 0 : index
    %c0_3 = arith.constant 0 : index
    %4 = vector.load %arg3[%c0_2, %c0_3] : memref<8x32xf32, #tpu.memory_space<vmem>>, vector<8x32xf32>
    %c0_4 = arith.constant 0 : index
    %c0_5 = arith.constant 0 : index
    %5 = vector.load %arg4[%c0_4, %c0_5] : memref<32x16xf32, #tpu.memory_space<vmem>>, vector<32x16xf32>
    %cst = arith.constant dense<0.000000e+00> : vector<8x16xf32>
    %6 = tpu.matmul %4, %5, %cst {dimension_numbers = #tpu.dot_dimension_numbers<[1], [0], [0], [1], [0, 0, 1, 1], [], []>} : vector<8x32xf32>, vector<32x16xf32>, vector<8x16xf32> -> vector<8x16xf32>
    %7 = arith.addf %3, %6 : vector<8x16xf32>
    %c0_6 = arith.constant 0 : index
    %c0_7 = arith.constant 0 : index
    %8 = vector.load %arg7[%c0_6, %c0_7] : memref<8x16xf32, #tpu.memory_space<vmem>>, vector<8x16xf32>
    tpu.vector_store %arg7[%c0_6, %c0_7], %7 {strides = array<i32>} : memref<8x16xf32, #tpu.memory_space<vmem>>, vector<8x16xf32>,
    %c0_i32_8 = arith.constant 0 : i32
    %9 = arith.cmpi eq, %arg2, %c0_i32_8 : i32
    %10 = arith.extui %9 : i1 to i32
    %c0_i32_9 = arith.constant 0 : i32
    %11 = arith.cmpi ne, %10, %c0_i32_9 : i32
    scf.if %11 {
      %c0_10 = arith.constant 0 : index
      %c0_11 = arith.constant 0 : index
      %12 = vector.load %arg7[%c0_10, %c0_11] : memref<8x16xf32, #tpu.memory_space<vmem>>, vector<8x16xf32>
      %c0_12 = arith.constant 0 : index
      %c0_13 = arith.constant 0 : index
      %13 = vector.load %arg5[%c0_12, %c0_13] : memref<1x16xf32, #tpu.memory_space<vmem>>, vector<1x16xf32>
      %14 = vector.broadcast %13 : vector<1x16xf32> to vector<8x16xf32>
      %15 = arith.addf %12, %14 : vector<8x16xf32>
      %c0_14 = arith.constant 0 : index
      %c0_15 = arith.constant 0 : index
      %16 = vector.load %arg6[%c0_14, %c0_15] : memref<8x16xf32, #tpu.memory_space<vmem>>, vector<8x16xf32>
      tpu.vector_store %arg6[%c0_14, %c0_15], %15 {strides = array<i32>} : memref<8x16xf32, #tpu.memory_space<vmem>>, vector<8x16xf32>,
    } else {
    }
    return
  }
  func.func @transform_0(%arg0: i32, %arg1: i32, %arg2: i32) -> (i32, i32) {
    %c0_i32 = arith.constant 0 : i32
    return %arg0, %arg2 : i32, i32
  }
  func.func @transform_1(%arg0: i32, %arg1: i32, %arg2: i32) -> (i32, i32) {
    %c0_i32 = arith.constant 0 : i32
    return %arg2, %arg1 : i32, i32
  }
  func.func @transform_2(%arg0: i32, %arg1: i32, %arg2: i32) -> (i32, i32) {
    %c0_i32 = arith.constant 0 : i32
    %c0_i32_0 = arith.constant 0 : i32
    return %c0_i32, %arg1 : i32, i32
  }
  func.func @transform_3(%arg0: i32, %arg1: i32, %arg2: i32) -> (i32, i32) {
    %c0_i32 = arith.constant 0 : i32
    return %arg0, %arg1 : i32, i32
  }
}

</mosaic_0001>

<bundles_post_ra>
// kernel: simple_model_forward.1
= control target key start
LH: loop header
LB: loop body
LE: loop exit
PB: predicated region body
PF: predicated region fallthrough
CT: control target
= control target key end

     0   :  { %v174_v1 = vmov 0.0   ;;  %vm175_vm0 = vmmov 0   ;;  %vm19_vm1 = vcmask 130048   ;;  %s221_s0 = inlined_call_operand.vmem [shape: f32[8,32], index: 0, kind: input, shape index: {}]   ;;  %s222_s1 = inlined_call_operand.vmem [shape: f32[32,16], index: 1, kind: input, shape index: {}]   ;;  %s223_s2 = inlined_call_operand.vmem [shape: f32[1,16], index: 2, kind: input, shape index: {}]   ;;  %s224_s3 = inlined_call_operand.hbm [shape: f32[8,16], index: 3, kind: output, shape index: {}]  }
   0x1   :  { %v26_v0 = vld [vmem:[%s222_s1 + $0x18] sm:$0xff]  ;;  %138 = vmatprep.subr.mxu0 %v174_v1  ;;  %v25_v2 = vld [vmem:[%s222_s1 + $0x10] sm:$0xff]  ;;  %146 = vmatprep.mubr.msk.f32.mxu0 %vm175_vm0, %v174_v1 }
   0x2   :  { %8 = vsyncpa [#allocation4], 0  ;;  %139 = vmatpush3.msra.mxu0 %v26_v0  ;;  %20 = vst.msk [vmem:[#allocation2] sm:$0xff] %vm19_vm1, %v174_v1  ;;  %v24_v3 = vld [vmem:[%s222_s1 + $0x8] sm:$0xff]  ;;  %v23_v4 = vld [vmem:[%s222_s1] sm:$0xff]  ;;  %vm27_vm2 = vcmask 261120  }
   0x3   :  { %140 = vmatprep.subr.mxu0 %v174_v1  ;;  %v22_v5 = vld [vmem:[%s221_s0] sm:$0xff]  ;;  %s176_s1 = smov [#allocation3]  }
   0x4   :  { %141 = vmatpush3.msra.mxu0 %v25_v2  ;;  %v132_v10 = vld [vmem:[%s223_s2] ss:$0 sm:$0xff]  ;;  %s123_s24 = sshll.u32 %s176_s1, 4  ;;  %s124_s24 = int_to_ptr.vmem [resolvable:$true] %s123_s24 }
   0x5   :  { %142 = vmatprep.subr.mxu0 %v174_v1  ;;  %s152_s0 = scalar_lea.vmem %s124_s24, 128  ;;  %p157_p1 = scmp.lt.s32.totalorder %s124_s24, %s124_s24 }
   0x6   :  { %143 = vmatpush3.msra.mxu0 %v24_v3  ;;  %p153_p0 = scmp.ne.s32.totalorder %s124_s24, %s152_s0  ;;  %p158_p2 = scmp.lt.s32.totalorder %s152_s0, %s152_s0 }
   0x7   :  { %144 = vmatprep.subr.mxu0 %v174_v1 }
   0x8   :  { %145 = vmatpush3.msra.mxu0 %v23_v4  ;;  %p159_p3 = por %p158_p2, %p157_p1 }
   0x9   :  { %147 = vmatmul.mubr.msk.f32.vlgmr.msra.gmra.mxu0 %vm27_vm2, %v22_v5  ;;  %v21_v6 = vld [vmem:[#allocation2] sm:$0xff] }
   0xa   :  { %p160_p4 = pnand %p159_p3, %p153_p0 }
  0xc9   :  { %v97_v7 = vpop.f32.mrf.mxu0 }
  0xca   :  { %v101_v8 = vadd.f32 %v97_v7, %v21_v6 }
  0xcb   :  { %v148_v9 = vpop.f32.mrf.mxu0 }
  0xcc   :  { %103 = vst.msk [vmem:[#allocation2] sm:$0xff] %vm19_vm1, %v101_v8 }
  0xd3   :  { %v107_v11 = vld [vmem:[#allocation2] sm:$0xff] }
  0xd4   :  { %v115_v12 = vadd.f32 %v132_v10, %v107_v11 }
  0xd6   :  { %116 = vst.msk [vmem:[#allocation3] sm:$0xff] %vm19_vm1, %v115_v12 }
  0xd7   :  { %163 = shalt.err (!%p160_p4)
}
  0xd8   :  { %126 = dma.vmem_to_hbm [thread:$0]  %s124_s24, 128, %s224_s3, [#allocation4]  }
  0xd9   :  { %172 = dma.done.wait [#allocation4], 128  }
  0xda   :  { %173 = vsyncadd [#allocation4], 4294967168 }
  0xdb   :  { %130 = vsyncpa [#allocation4], 1 }

</bundles_post_ra>
